<compile_context>
chip_gen: v5e
topology: v5e:2x2
jax: 0.10.0
libtpu: 0.0.40
codegen_flags: <defaults>
</compile_context>

<pallas_src>
import jax
import jax.numpy as jnp
from jax.experimental import pallas as pl
from jax.experimental.pallas import tpu as pltpu


# ---------------------------------------------------------------------------
# Kernel
# ---------------------------------------------------------------------------

def cnp_fused_kernel(ctx_ref, xt_ref, w_ref, b_ref, out_ref):
    """Fused encoder + mean + q_encoder + decoder for TB batches per grid step.

    ctx_ref : (TB, Nc, P)   padded concat([xc, yc], -1)
    xt_ref  : (TB, Nt, P)   padded xt
    w_ref   : (10, P, P)    [enc_w1..3, q_w1..3, dec_w1_z, dec_w1_q, dec_w2, dec_w3]
    b_ref   : (9, 1, P)     [enc_b1..3, q_b1..3, dec_b1..3]
    out_ref : (TB, Nt, P)   padded output (only first dim_yt lanes are meaningful)
    """
    TB, Nc, P = ctx_ref.shape
    Nt = xt_ref.shape[1]
    f32 = jnp.float32

    # ---- encoder MLP over the context set -> per-batch latent z -------------
    x = ctx_ref[...].reshape(TB * Nc, P)
    h = jnp.maximum(jnp.dot(x, w_ref[0], preferred_element_type=f32) + b_ref[0], 0.0)
    h = jnp.maximum(jnp.dot(h, w_ref[1], preferred_element_type=f32) + b_ref[1], 0.0)
    h = jnp.dot(h, w_ref[2], preferred_element_type=f32) + b_ref[2]
    z = jnp.mean(h.reshape(TB, Nc, P), axis=1)                       # (TB, P)

    # decoder layer-1 z contribution, hoisted out of the Nt axis:
    #   concat([z, q], -1) @ W1  ==  z @ W1_z + q @ W1_q
    z_proj = jnp.dot(z, w_ref[6], preferred_element_type=f32) + b_ref[6]   # (TB, P)

    # ---- q_encoder MLP on the targets ---------------------------------------
    q = xt_ref[...].reshape(TB * Nt, P)
    q = jnp.maximum(jnp.dot(q, w_ref[3], preferred_element_type=f32) + b_ref[3], 0.0)
    q = jnp.maximum(jnp.dot(q, w_ref[4], preferred_element_type=f32) + b_ref[4], 0.0)
    q = jnp.dot(q, w_ref[5], preferred_element_type=f32) + b_ref[5]        # (TB*Nt, P)

    # ---- decoder MLP ---------------------------------------------------------
    h1 = jnp.dot(q, w_ref[7], preferred_element_type=f32)                  # (TB*Nt, P)
    h1 = h1.reshape(TB, Nt, P) + z_proj[:, None, :]                        # broadcast z
    h1 = jnp.maximum(h1.reshape(TB * Nt, P), 0.0)
    h2 = jnp.maximum(jnp.dot(h1, w_ref[8], preferred_element_type=f32) + b_ref[7], 0.0)
    out = jnp.dot(h2, w_ref[9], preferred_element_type=f32) + b_ref[8]     # (TB*Nt, P)
    out_ref[...] = out.reshape(TB, Nt, P)


# ---------------------------------------------------------------------------
# Wrapper
# ---------------------------------------------------------------------------

def _round_up(x, m):
    return ((x + m - 1) // m) * m


def _choose_tb(batch, rows):
    """Batches per grid step: aim for ~128 matmul rows, keep >=2 grid steps
    when batch >= 2 so v7x's second TensorCore gets work via the parallel axis."""
    tb = max(1, min(batch, max(1, 128 // max(rows, 1))))
    while batch % tb:
        tb -= 1
    if batch >= 2 and batch // tb < 2:
        tb = max(1, batch // 2)
        while batch % tb:
            tb -= 1
    return tb


def cnp_dist_forward(xc, yc, xt, params, *, lane=128):
    B, Nc, dim_x = xc.shape
    dim_yc = yc.shape[-1]
    Nt = xt.shape[1]
    H = params["enc_w3"].shape[-1]
    dim_yt = params["dec_w3"].shape[-1]

    # Pad every feature dim to one common multiple of 128 lanes.
    P = _round_up(max(dim_x + dim_yc, dim_x, H, dim_yt), lane)

    def padw(w):  # (din, dout) -> (P, P), zero-padded
        return jnp.pad(w, ((0, P - w.shape[0]), (0, P - w.shape[1])))

    def padb(b):  # (1, dout) -> (1, P)
        return jnp.pad(b, ((0, 0), (0, P - b.shape[-1])))

    # Split decoder first-layer weight (2H, H) into z-part / q-part.
    dwz = params["dec_w1"][:H, :]
    dwq = params["dec_w1"][H:, :]

    W = jnp.stack([
        padw(params["enc_w1"]), padw(params["enc_w2"]), padw(params["enc_w3"]),
        padw(params["q_w1"]),   padw(params["q_w2"]),   padw(params["q_w3"]),
        padw(dwz),              padw(dwq),
        padw(params["dec_w2"]), padw(params["dec_w3"]),
    ])                                                           # (10, P, P)
    Bst = jnp.stack([
        padb(params["enc_b1"]), padb(params["enc_b2"]), padb(params["enc_b3"]),
        padb(params["q_b1"]),   padb(params["q_b2"]),   padb(params["q_b3"]),
        padb(params["dec_b1"]), padb(params["dec_b2"]), padb(params["dec_b3"]),
    ])                                                           # (9, 1, P)

    # Wrapper-side glue: concat context, zero-pad features to P lanes.
    ctx = jnp.concatenate([xc, yc], axis=-1)
    ctx = jnp.pad(ctx, ((0, 0), (0, 0), (0, P - ctx.shape[-1])))
    xtp = jnp.pad(xt, ((0, 0), (0, 0), (0, P - dim_x)))

    TB = _choose_tb(B, Nc)
    grid = (B // TB,)

    out_padded = pl.pallas_call(
        cnp_fused_kernel,
        out_shape=jax.ShapeDtypeStruct((B, Nt, P), jnp.float32),
        grid_spec=pltpu.PrefetchScalarGridSpec(
            num_scalar_prefetch=0,
            grid=grid,
            in_specs=[
                pl.BlockSpec((TB, Nc, P), lambda b: (b, 0, 0)),   # context set
                pl.BlockSpec((TB, Nt, P), lambda b: (b, 0, 0)),   # targets
                pl.BlockSpec((10, P, P), lambda b: (0, 0, 0)),    # stacked weights
                pl.BlockSpec((9, 1, P), lambda b: (0, 0, 0)),     # stacked biases
            ],
            out_specs=pl.BlockSpec((TB, Nt, P), lambda b: (b, 0, 0)),
        ),
        compiler_params=pltpu.CompilerParams(dimension_semantics=("parallel",)),
    )(ctx, xtp, W, Bst)

    return out_padded[..., :dim_yt]


# ---------------------------------------------------------------------------
# Deterministic parameter init + pure-JAX reference
# ---------------------------------------------------------------------------

def init_params(key, dim_x, dim_yc, dim_yt, dim_h):
    def linear(k, din, dout):
        kw, kb = jax.random.split(k)
        scale = 1.0 / jnp.sqrt(din)
        w = jax.random.uniform(kw, (din, dout), jnp.float32, -scale, scale)
        b = jax.random.uniform(kb, (1, dout), jnp.float32, -scale, scale)
        return w, b

    keys = jax.random.split(key, 9)
    p = {}
    # encoder: [dim_x + dim_yc, H, H, H]
    p["enc_w1"], p["enc_b1"] = linear(keys[0], dim_x + dim_yc, dim_h)
    p["enc_w2"], p["enc_b2"] = linear(keys[1], dim_h, dim_h)
    p["enc_w3"], p["enc_b3"] = linear(keys[2], dim_h, dim_h)
    # q_encoder: [dim_x, H, H, H]
    p["q_w1"], p["q_b1"] = linear(keys[3], dim_x, dim_h)
    p["q_w2"], p["q_b2"] = linear(keys[4], dim_h, dim_h)
    p["q_w3"], p["q_b3"] = linear(keys[5], dim_h, dim_h)
    # decoder: [2H, H, H, dim_yt]
    p["dec_w1"], p["dec_b1"] = linear(keys[6], 2 * dim_h, dim_h)
    p["dec_w2"], p["dec_b2"] = linear(keys[7], dim_h, dim_h)
    p["dec_w3"], p["dec_b3"] = linear(keys[8], dim_h, dim_yt)
    return p


def cnp_dist_reference(xc, yc, xt, p):
    def mlp(x, w1, b1, w2, b2, w3, b3):
        h = jnp.maximum(x @ w1 + b1, 0.0)
        h = jnp.maximum(h @ w2 + b2, 0.0)
        return h @ w3 + b3

    inputs = mlp(jnp.concatenate([xc, yc], -1),
                 p["enc_w1"], p["enc_b1"], p["enc_w2"], p["enc_b2"],
                 p["enc_w3"], p["enc_b3"])
    latents = inputs.mean(axis=1, keepdims=True)
    z = jnp.broadcast_to(latents, (xt.shape[0], xt.shape[1], latents.shape[-1]))
    q = mlp(xt, p["q_w1"], p["q_b1"], p["q_w2"], p["q_b2"], p["q_w3"], p["q_b3"])
    return mlp(jnp.concatenate([z, q], -1),
               p["dec_w1"], p["dec_b1"], p["dec_w2"], p["dec_b2"],
               p["dec_w3"], p["dec_b3"])


# ---------------------------------------------------------------------------
if __name__ == "__main__":
    dim_x, dim_yc, dim_yt, dim_h = 8, 4, 4, 32
    B, Nc, Nt = 2, 16, 8

    key = jax.random.PRNGKey(0)
    k_xc, k_yc, k_xt, k_p = jax.random.split(key, 4)
    xc = jax.random.normal(k_xc, (B, Nc, dim_x), jnp.float32)
    yc = jax.random.normal(k_yc, (B, Nc, dim_yc), jnp.float32)
    xt = jax.random.normal(k_xt, (B, Nt, dim_x), jnp.float32)
    params = init_params(k_p, dim_x, dim_yc, dim_yt, dim_h)

    out = cnp_dist_forward(xc, yc, xt, params)
    out = jax.block_until_ready(out)

    ref = cnp_dist_reference(xc, yc, xt, params)
    assert out.shape == (B, Nt, dim_yt)
    assert jnp.allclose(out, ref, atol=1e-5, rtol=1e-5), "mismatch vs reference"

    print("KERNEL_OK")
</pallas_src>

<mosaic_0001>
module attributes {stable_mosaic.version = 11 : i64} {
  func.func @cnp_fused_kernel(%arg0: i32, %arg1: memref<1x16x128xf32, #tpu.memory_space<vmem>>, %arg2: memref<1x8x128xf32, #tpu.memory_space<vmem>>, %arg3: memref<10x128x128xf32, #tpu.memory_space<vmem>>, %arg4: memref<9x1x128xf32, #tpu.memory_space<vmem>>, %arg5: memref<1x8x128xf32, #tpu.memory_space<vmem>>) attributes {dimension_semantics = [#tpu.dimension_semantics<parallel>], iteration_bounds = array<i64: 2>, scalar_prefetch = 0 : i64, scratch_operands = 0 : i64, tpu.core_type = #tpu.core_type<tc>, window_params = [{transform_indices = @transform_0, window_bounds = array<i64: 1, 16, 128>}, {transform_indices = @transform_1, window_bounds = array<i64: 1, 8, 128>}, {pipeline_mode = #tpu.pipeline_mode<synchronous>, transform_indices = @transform_2, window_bounds = array<i64: 10, 128, 128>}, {pipeline_mode = #tpu.pipeline_mode<synchronous>, transform_indices = @transform_3, window_bounds = array<i64: 9, 1, 128>}, {transform_indices = @transform_4, window_bounds = array<i64: 1, 8, 128>}]} {
    %c0 = arith.constant 0 : index
    %c0_0 = arith.constant 0 : index
    %c0_1 = arith.constant 0 : index
    %0 = vector.load %arg1[%c0, %c0_0, %c0_1] : memref<1x16x128xf32, #tpu.memory_space<vmem>>, vector<1x16x128xf32>
    %1 = vector.shape_cast %0 : vector<1x16x128xf32> to vector<16x128xf32>
    %c0_2 = arith.constant 0 : index
    %c0_3 = arith.constant 0 : index
    %c0_4 = arith.constant 0 : index
    %2 = vector.load %arg3[%c0_2, %c0_3, %c0_4] : memref<10x128x128xf32, #tpu.memory_space<vmem>>, vector<1x128x128xf32>
    %3 = vector.shape_cast %2 : vector<1x128x128xf32> to vector<128x128xf32>
    %cst = arith.constant dense<0.000000e+00> : vector<16x128xf32>
    %4 = tpu.matmul %1, %3, %cst {dimension_numbers = #tpu.dot_dimension_numbers<[1], [0], [0], [1], [0, 0, 1, 1], [], []>} : vector<16x128xf32>, vector<128x128xf32>, vector<16x128xf32> -> vector<16x128xf32>
    %c0_5 = arith.constant 0 : index
    %c0_6 = arith.constant 0 : index
    %c0_7 = arith.constant 0 : index
    %5 = vector.load %arg4[%c0_5, %c0_6, %c0_7] : memref<9x1x128xf32, #tpu.memory_space<vmem>>, vector<1x1x128xf32>
    %6 = vector.shape_cast %5 : vector<1x1x128xf32> to vector<1x128xf32>
    %7 = vector.broadcast %6 : vector<1x128xf32> to vector<16x128xf32>
    %8 = arith.addf %4, %7 : vector<16x128xf32>
    %cst_8 = arith.constant 0.000000e+00 : f32
    %9 = vector.broadcast %cst_8 : f32 to vector<16x128xf32>
    %10 = arith.maximumf %8, %9 : vector<16x128xf32>
    %c1 = arith.constant 1 : index
    %c0_9 = arith.constant 0 : index
    %c0_10 = arith.constant 0 : index
    %11 = vector.load %arg3[%c1, %c0_9, %c0_10] : memref<10x128x128xf32, #tpu.memory_space<vmem>>, vector<1x128x128xf32>
    %12 = vector.shape_cast %11 : vector<1x128x128xf32> to vector<128x128xf32>
    %cst_11 = arith.constant dense<0.000000e+00> : vector<16x128xf32>
    %13 = tpu.matmul %10, %12, %cst_11 {dimension_numbers = #tpu.dot_dimension_numbers<[1], [0], [0], [1], [0, 0, 1, 1], [], []>} : vector<16x128xf32>, vector<128x128xf32>, vector<16x128xf32> -> vector<16x128xf32>
    %c1_12 = arith.constant 1 : index
    %c0_13 = arith.constant 0 : index
    %c0_14 = arith.constant 0 : index
    %14 = vector.load %arg4[%c1_12, %c0_13, %c0_14] : memref<9x1x128xf32, #tpu.memory_space<vmem>>, vector<1x1x128xf32>
    %15 = vector.shape_cast %14 : vector<1x1x128xf32> to vector<1x128xf32>
    %16 = vector.broadcast %15 : vector<1x128xf32> to vector<16x128xf32>
    %17 = arith.addf %13, %16 : vector<16x128xf32>
    %cst_15 = arith.constant 0.000000e+00 : f32
    %18 = vector.broadcast %cst_15 : f32 to vector<16x128xf32>
    %19 = arith.maximumf %17, %18 : vector<16x128xf32>
    %c2 = arith.constant 2 : index
    %c0_16 = arith.constant 0 : index
    %c0_17 = arith.constant 0 : index
    %20 = vector.load %arg3[%c2, %c0_16, %c0_17] : memref<10x128x128xf32, #tpu.memory_space<vmem>>, vector<1x128x128xf32>
    %21 = vector.shape_cast %20 : vector<1x128x128xf32> to vector<128x128xf32>
    %cst_18 = arith.constant dense<0.000000e+00> : vector<16x128xf32>
    %22 = tpu.matmul %19, %21, %cst_18 {dimension_numbers = #tpu.dot_dimension_numbers<[1], [0], [0], [1], [0, 0, 1, 1], [], []>} : vector<16x128xf32>, vector<128x128xf32>, vector<16x128xf32> -> vector<16x128xf32>
    %c2_19 = arith.constant 2 : index
    %c0_20 = arith.constant 0 : index
    %c0_21 = arith.constant 0 : index
    %23 = vector.load %arg4[%c2_19, %c0_20, %c0_21] : memref<9x1x128xf32, #tpu.memory_space<vmem>>, vector<1x1x128xf32>
    %24 = vector.shape_cast %23 : vector<1x1x128xf32> to vector<1x128xf32>
    %25 = vector.broadcast %24 : vector<1x128xf32> to vector<16x128xf32>
    %26 = arith.addf %22, %25 : vector<16x128xf32>
    %27 = vector.shape_cast %26 : vector<16x128xf32> to vector<1x16x128xf32>
    %cst_22 = arith.constant dense<0.000000e+00> : vector<1x128xf32>
    %28 = vector.multi_reduction <add>, %27, %cst_22 [1] : vector<1x16x128xf32> to vector<1x128xf32>
    %cst_23 = arith.constant 1.600000e+01 : f32
    %29 = vector.broadcast %cst_23 : f32 to vector<1x128xf32>
    %30 = arith.divf %28, %29 : vector<1x128xf32>
    %c6 = arith.constant 6 : index
    %c0_24 = arith.constant 0 : index
    %c0_25 = arith.constant 0 : index
    %31 = vector.load %arg3[%c6, %c0_24, %c0_25] : memref<10x128x128xf32, #tpu.memory_space<vmem>>, vector<1x128x128xf32>
    %32 = vector.shape_cast %31 : vector<1x128x128xf32> to vector<128x128xf32>
    %cst_26 = arith.constant dense<0.000000e+00> : vector<1x128xf32>
    %33 = tpu.matmul %30, %32, %cst_26 {dimension_numbers = #tpu.dot_dimension_numbers<[1], [0], [0], [1], [0, 0, 1, 1], [], []>} : vector<1x128xf32>, vector<128x128xf32>, vector<1x128xf32> -> vector<1x128xf32>
    %c6_27 = arith.constant 6 : index
    %c0_28 = arith.constant 0 : index
    %c0_29 = arith.constant 0 : index
    %34 = vector.load %arg4[%c6_27, %c0_28, %c0_29] : memref<9x1x128xf32, #tpu.memory_space<vmem>>, vector<1x1x128xf32>
    %35 = vector.shape_cast %34 : vector<1x1x128xf32> to vector<1x128xf32>
    %36 = arith.addf %33, %35 : vector<1x128xf32>
    %c0_30 = arith.constant 0 : index
    %c0_31 = arith.constant 0 : index
    %c0_32 = arith.constant 0 : index
    %37 = vector.load %arg2[%c0_30, %c0_31, %c0_32] : memref<1x8x128xf32, #tpu.memory_space<vmem>>, vector<1x8x128xf32>
    %38 = vector.shape_cast %37 : vector<1x8x128xf32> to vector<8x128xf32>
    %c3 = arith.constant 3 : index
    %c0_33 = arith.constant 0 : index
    %c0_34 = arith.constant 0 : index
    %39 = vector.load %arg3[%c3, %c0_33, %c0_34] : memref<10x128x128xf32, #tpu.memory_space<vmem>>, vector<1x128x128xf32>
    %40 = vector.shape_cast %39 : vector<1x128x128xf32> to vector<128x128xf32>
    %cst_35 = arith.constant dense<0.000000e+00> : vector<8x128xf32>
    %41 = tpu.matmul %38, %40, %cst_35 {dimension_numbers = #tpu.dot_dimension_numbers<[1], [0], [0], [1], [0, 0, 1, 1], [], []>} : vector<8x128xf32>, vector<128x128xf32>, vector<8x128xf32> -> vector<8x128xf32>
    %c3_36 = arith.constant 3 : index
    %c0_37 = arith.constant 0 : index
    %c0_38 = arith.constant 0 : index
    %42 = vector.load %arg4[%c3_36, %c0_37, %c0_38] : memref<9x1x128xf32, #tpu.memory_space<vmem>>, vector<1x1x128xf32>
    %43 = vector.shape_cast %42 : vector<1x1x128xf32> to vector<1x128xf32>
    %44 = vector.broadcast %43 : vector<1x128xf32> to vector<8x128xf32>
    %45 = arith.addf %41, %44 : vector<8x128xf32>
    %cst_39 = arith.constant 0.000000e+00 : f32
    %46 = vector.broadcast %cst_39 : f32 to vector<8x128xf32>
    %47 = arith.maximumf %45, %46 : vector<8x128xf32>
    %c4 = arith.constant 4 : index
    %c0_40 = arith.constant 0 : index
    %c0_41 = arith.constant 0 : index
    %48 = vector.load %arg3[%c4, %c0_40, %c0_41] : memref<10x128x128xf32, #tpu.memory_space<vmem>>, vector<1x128x128xf32>
    %49 = vector.shape_cast %48 : vector<1x128x128xf32> to vector<128x128xf32>
    %cst_42 = arith.constant dense<0.000000e+00> : vector<8x128xf32>
    %50 = tpu.matmul %47, %49, %cst_42 {dimension_numbers = #tpu.dot_dimension_numbers<[1], [0], [0], [1], [0, 0, 1, 1], [], []>} : vector<8x128xf32>, vector<128x128xf32>, vector<8x128xf32> -> vector<8x128xf32>
    %c4_43 = arith.constant 4 : index
    %c0_44 = arith.constant 0 : index
    %c0_45 = arith.constant 0 : index
    %51 = vector.load %arg4[%c4_43, %c0_44, %c0_45] : memref<9x1x128xf32, #tpu.memory_space<vmem>>, vector<1x1x128xf32>
    %52 = vector.shape_cast %51 : vector<1x1x128xf32> to vector<1x128xf32>
    %53 = vector.broadcast %52 : vector<1x128xf32> to vector<8x128xf32>
    %54 = arith.addf %50, %53 : vector<8x128xf32>
    %cst_46 = arith.constant 0.000000e+00 : f32
    %55 = vector.broadcast %cst_46 : f32 to vector<8x128xf32>
    %56 = arith.maximumf %54, %55 : vector<8x128xf32>
    %c5 = arith.constant 5 : index
    %c0_47 = arith.constant 0 : index
    %c0_48 = arith.constant 0 : index
    %57 = vector.load %arg3[%c5, %c0_47, %c0_48] : memref<10x128x128xf32, #tpu.memory_space<vmem>>, vector<1x128x128xf32>
    %58 = vector.shape_cast %57 : vector<1x128x128xf32> to vector<128x128xf32>
    %cst_49 = arith.constant dense<0.000000e+00> : vector<8x128xf32>
    %59 = tpu.matmul %56, %58, %cst_49 {dimension_numbers = #tpu.dot_dimension_numbers<[1], [0], [0], [1], [0, 0, 1, 1], [], []>} : vector<8x128xf32>, vector<128x128xf32>, vector<8x128xf32> -> vector<8x128xf32>
    %c5_50 = arith.constant 5 : index
    %c0_51 = arith.constant 0 : index
    %c0_52 = arith.constant 0 : index
    %60 = vector.load %arg4[%c5_50, %c0_51, %c0_52] : memref<9x1x128xf32, #tpu.memory_space<vmem>>, vector<1x1x128xf32>
    %61 = vector.shape_cast %60 : vector<1x1x128xf32> to vector<1x128xf32>
    %62 = vector.broadcast %61 : vector<1x128xf32> to vector<8x128xf32>
    %63 = arith.addf %59, %62 : vector<8x128xf32>
    %c7 = arith.constant 7 : index
    %c0_53 = arith.constant 0 : index
    %c0_54 = arith.constant 0 : index
    %64 = vector.load %arg3[%c7, %c0_53, %c0_54] : memref<10x128x128xf32, #tpu.memory_space<vmem>>, vector<1x128x128xf32>
    %65 = vector.shape_cast %64 : vector<1x128x128xf32> to vector<128x128xf32>
    %cst_55 = arith.constant dense<0.000000e+00> : vector<8x128xf32>
    %66 = tpu.matmul %63, %65, %cst_55 {dimension_numbers = #tpu.dot_dimension_numbers<[1], [0], [0], [1], [0, 0, 1, 1], [], []>} : vector<8x128xf32>, vector<128x128xf32>, vector<8x128xf32> -> vector<8x128xf32>
    %67 = vector.shape_cast %66 : vector<8x128xf32> to vector<1x8x128xf32>
    %68 = vector.shape_cast %36 : vector<1x128xf32> to vector<1x1x128xf32>
    %69 = vector.broadcast %68 : vector<1x1x128xf32> to vector<1x8x128xf32>
    %70 = arith.addf %67, %69 : vector<1x8x128xf32>
    %71 = vector.shape_cast %70 : vector<1x8x128xf32> to vector<8x128xf32>
    %cst_56 = arith.constant 0.000000e+00 : f32
    %72 = vector.broadcast %cst_56 : f32 to vector<8x128xf32>
    %73 = arith.maximumf %71, %72 : vector<8x128xf32>
    %c8 = arith.constant 8 : index
    %c0_57 = arith.constant 0 : index
    %c0_58 = arith.constant 0 : index
    %74 = vector.load %arg3[%c8, %c0_57, %c0_58] : memref<10x128x128xf32, #tpu.memory_space<vmem>>, vector<1x128x128xf32>
    %75 = vector.shape_cast %74 : vector<1x128x128xf32> to vector<128x128xf32>
    %cst_59 = arith.constant dense<0.000000e+00> : vector<8x128xf32>
    %76 = tpu.matmul %73, %75, %cst_59 {dimension_numbers = #tpu.dot_dimension_numbers<[1], [0], [0], [1], [0, 0, 1, 1], [], []>} : vector<8x128xf32>, vector<128x128xf32>, vector<8x128xf32> -> vector<8x128xf32>
    %c7_60 = arith.constant 7 : index
    %c0_61 = arith.constant 0 : index
    %c0_62 = arith.constant 0 : index
    %77 = vector.load %arg4[%c7_60, %c0_61, %c0_62] : memref<9x1x128xf32, #tpu.memory_space<vmem>>, vector<1x1x128xf32>
    %78 = vector.shape_cast %77 : vector<1x1x128xf32> to vector<1x128xf32>
    %79 = vector.broadcast %78 : vector<1x128xf32> to vector<8x128xf32>
    %80 = arith.addf %76, %79 : vector<8x128xf32>
    %cst_63 = arith.constant 0.000000e+00 : f32
    %81 = vector.broadcast %cst_63 : f32 to vector<8x128xf32>
    %82 = arith.maximumf %80, %81 : vector<8x128xf32>
    %c9 = arith.constant 9 : index
    %c0_64 = arith.constant 0 : index
    %c0_65 = arith.constant 0 : index
    %83 = vector.load %arg3[%c9, %c0_64, %c0_65] : memref<10x128x128xf32, #tpu.memory_space<vmem>>, vector<1x128x128xf32>
    %84 = vector.shape_cast %83 : vector<1x128x128xf32> to vector<128x128xf32>
    %cst_66 = arith.constant dense<0.000000e+00> : vector<8x128xf32>
    %85 = tpu.matmul %82, %84, %cst_66 {dimension_numbers = #tpu.dot_dimension_numbers<[1], [0], [0], [1], [0, 0, 1, 1], [], []>} : vector<8x128xf32>, vector<128x128xf32>, vector<8x128xf32> -> vector<8x128xf32>
    %c8_67 = arith.constant 8 : index
    %c0_68 = arith.constant 0 : index
    %c0_69 = arith.constant 0 : index
    %86 = vector.load %arg4[%c8_67, %c0_68, %c0_69] : memref<9x1x128xf32, #tpu.memory_space<vmem>>, vector<1x1x128xf32>
    %87 = vector.shape_cast %86 : vector<1x1x128xf32> to vector<1x128xf32>
    %88 = vector.broadcast %87 : vector<1x128xf32> to vector<8x128xf32>
    %89 = arith.addf %85, %88 : vector<8x128xf32>
    %90 = vector.shape_cast %89 : vector<8x128xf32> to vector<1x8x128xf32>
    %c0_70 = arith.constant 0 : index
    %c0_71 = arith.constant 0 : index
    %c0_72 = arith.constant 0 : index
    %91 = vector.load %arg5[%c0_70, %c0_71, %c0_72] : memref<1x8x128xf32, #tpu.memory_space<vmem>>, vector<1x8x128xf32>
    tpu.vector_store %arg5[%c0_70, %c0_71, %c0_72], %90 {strides = array<i32>} : memref<1x8x128xf32, #tpu.memory_space<vmem>>, vector<1x8x128xf32>,
    return
  }
  func.func @transform_0(%arg0: i32) -> (i32, i32, i32) {
    %c0_i32 = arith.constant 0 : i32
    %c0_i32_0 = arith.constant 0 : i32
    %c0_i32_1 = arith.constant 0 : i32
    return %arg0, %c0_i32, %c0_i32_0 : i32, i32, i32
  }
  func.func @transform_1(%arg0: i32) -> (i32, i32, i32) {
    %c0_i32 = arith.constant 0 : i32
    %c0_i32_0 = arith.constant 0 : i32
    %c0_i32_1 = arith.constant 0 : i32
    return %arg0, %c0_i32, %c0_i32_0 : i32, i32, i32
  }
  func.func @transform_2(%arg0: i32) -> (i32, i32, i32) {
    %c0_i32 = arith.constant 0 : i32
    %c0_i32_0 = arith.constant 0 : i32
    %c0_i32_1 = arith.constant 0 : i32
    %c0_i32_2 = arith.constant 0 : i32
    return %c0_i32, %c0_i32_0, %c0_i32_1 : i32, i32, i32
  }
  func.func @transform_3(%arg0: i32) -> (i32, i32, i32) {
    %c0_i32 = arith.constant 0 : i32
    %c0_i32_0 = arith.constant 0 : i32
    %c0_i32_1 = arith.constant 0 : i32
    %c0_i32_2 = arith.constant 0 : i32
    return %c0_i32, %c0_i32_0, %c0_i32_1 : i32, i32, i32
  }
  func.func @transform_4(%arg0: i32) -> (i32, i32, i32) {
    %c0_i32 = arith.constant 0 : i32
    %c0_i32_0 = arith.constant 0 : i32
    %c0_i32_1 = arith.constant 0 : i32
    return %arg0, %c0_i32, %c0_i32_0 : i32, i32, i32
  }
}

</mosaic_0001>

<bundles_post_ra>
// kernel: tpu_custom_call.1
= control target key start
LH: loop header
LB: loop body
LE: loop exit
PB: predicated region body
PF: predicated region fallthrough
CT: control target
= control target key end

     0   :  { %s1398_s0 = inlined_call_operand.hbm [shape: f32[2,16,128], index: 0, kind: input, shape index: {}]   ;;  %s1399_s1 = inlined_call_operand.hbm [shape: f32[2,8,128], index: 1, kind: input, shape index: {}]   ;;  %s1400_s2 = inlined_call_operand.hbm [shape: f32[10,128,128], index: 2, kind: input, shape index: {}]   ;;  %s1401_s3 = inlined_call_operand.hbm [shape: f32[9,1,128], index: 3, kind: input, shape index: {}]   ;;  %s1402_s4 = inlined_call_operand.hbm [shape: f32[2,8,128], index: 4, kind: output, shape index: {}]  }
   0x1   :  { %1405 = sst [smem:[#allocation17_spill]] %s1400_s2 }
   0x2   :  { %1406 = sst [smem:[#allocation18_spill]] %s1401_s3 }
   0x3   :  { %9 = vsyncpa [#allocation3], 0 }
   0x4   :  { %11 = vsyncpa [#allocation3 + $0x1], 0 }
   0x5   :  { %12 = vsyncpa [#allocation6], 0 }
   0x6   :  { %14 = vsyncpa [#allocation6 + $0x1], 0 }
   0x7   :  { %15 = vsyncpa [#allocation9], 0 }
   0x8   :  { %16 = vsyncpa [#allocation4], 0 }
   0x9   :  { %18 = vsyncpa [#allocation4 + $0x1], 0  ;;  %s1206_s15 = smov 0   ;;  %s1208_s16 = smov 0  }
   0xa   :  { %s1210_s17 = smov 0   ;;  %s1212_s18 = smov 0  }
   0xb LB: > { %s1227_s19 = sadd.s32 4294967295, %s1172_s18   ;;  %s866_s20 = sadd.s32 4294967294, %s1172_s18   ;;  %s1172_s18 = sphi %s1212_s18, %s1422_s18   ;;  %s1168_s17 = sphi %s1210_s17, %s1421_s17   ;;  %s1164_s16 = sphi %s1208_s16, %s1420_s16   ;;  %s1160_s15 = sphi %s1206_s15, %s1419_s15  }
   0xc   : > { %p44_p0 = scmp.ne.s32.totalorder %s1164_s16, %s1160_s15  ;;  %p45_p1 = scmp.eq.s32.totalorder %s1227_s19, 0 }
   0xd   : > { %p136_p2 = scmp.eq.s32.totalorder %s1227_s19, 1  ;;  %p142_p3 = scmp.eq.s32.totalorder %s866_s20, 1 }
   0xe   : > { %p1236_p4 = por %p45_p1, %p44_p0  ;;  %p867_p5 = scmp.ge.s32.totalorder %s1172_s18, 1 }
   0xf   : > { %p1241_p6 = por %p142_p3, %p44_p0  ;;  %p149_p7 = scmp.lt.s32.totalorder %s1172_s18, 3 }
  0x10   : > { %s1409_s2 = sld [smem:[#allocation17_spill]]  ;;  %s1174_s27 = smov [#allocation7]  }
  0x11   : > { %p1249_p8 = pnand %p867_p5, %p149_p7  ;;  %s162_s28 = sshll.u32 %s1174_s27, 4  ;;  %s163_s28 = int_to_ptr.vmem [resolvable:$true] %s162_s28 }
  0x12   : > { %s1411_s3 = sld [smem:[#allocation18_spill]]  ;;  %s1403_s6 = smov 128  }
  0x13   : > { %p901_p9 = pneg %p1249_p8  ;;  %s1404_s7 = smov 8  }
  0x14   : > { %s1177_s8 = smov [#allocation8]   ;;  %s1178_s10 = smov 16  }
  0x15   : > { %p902_p10 = pnand %p901_p9, %p45_p1  ;;  %s176_s9 = sshll.u32 %s1177_s8, 4  ;;  %s177_s9 = int_to_ptr.vmem [resolvable:$true] %s176_s9 }
  0x16   : > { %s160_s25 = sshll.u32 %s1409_s2, 4  ;;  %s1179_s11 = smov 1   ;;  %s161_s25 = int_to_ptr.hbm [resolvable:$true] %s160_s25 }
  0x17   : > { %904 = dma.hbm_to_vmem [thread:$0]  (!%p902_p10), %s161_s25, 20480, %s163_s28, [#allocation6], %s1403_s6, %s1403_s6, %s1404_s7  }
  0x18   : > { %s174_s5 = sshll.u32 %s1411_s3, 4  ;;  %s1265_s12 = sadd.s32 1, %s1172_s18   ;;  %s175_s5 = int_to_ptr.hbm [resolvable:$true] %s174_s5 }
  0x19   : > { %907 = dma.hbm_to_vmem [thread:$0]  (!%p902_p10), %s175_s5, 144, %s177_s9, [#allocation9], %s1178_s10, %s1178_s10, %s1179_s11  }
  0x1a   : > { %s28_s13 = ssub.s32 %s1172_s18, %s1265_s12  ;;  %s31_s14 = sadd.s32 1, %s1168_s17 }
  0x1b   : > { %p29_p12 = scmp.eq.s32.totalorder %s28_s13, 0  ;;  %p38_p13 = scmp.ne.s32.totalorder %s1168_s17, %s1164_s16 }
  0x1c   : > { %p39_p0 = scmp.eq.s32.totalorder %s1172_s18, 0  ;;  %p921_p7 = scmp.lt.s32.totalorder %s1172_s18, 2 }
  0x1d   : > { %s1274_s20 = scalar_select %p29_p12, %s1168_s17, %s31_s14  }
  0x1e   : > { %p40_p3 = por %p39_p0, %p38_p13  ;;  %p1278_p5 = por %p136_p2, %p38_p13 }
  0x1f   : > { %1412 = sst [smem:[#allocation16_spill]] %s1274_s20  ;;  %s1284_s24 = sand.u32 1, %s1168_s17  }
  0x20   : > { %s871_s25 = sshll.u32 %s1284_s24, 4  ;;  %s886_s27 = sshll.u32 %s1172_s18, 4 }
  0x21   : > { %s199_s30 = scalar_lea.hbm %s1398_s0, %s886_s27  ;;  %s194_s5 = scalar_lea.vmem [#allocation2], %s871_s25 }
  0x22   : > { %s202_s8 = sshll.u32 %s194_s5, 4  ;;  %s200_s9 = sshll.u32 %s199_s30, 4  ;;  %s203_s8 = int_to_ptr.vmem [resolvable:$true] %s202_s8  ;;  %s201_s9 = int_to_ptr.hbm [resolvable:$true] %s200_s9 }
  0x23   : > { %p1291_p2 = pnand %p921_p7, %p40_p3  ;;  %s212_s11 = sand.u32 1, %s1172_s18  }
  0x24   : > { %s874_s13 = sshll.u32 %s1284_s24, 3  ;;  %s191_s14 = scalar_lea.sflag [#allocation3], %s1284_s24 }
  0x25   : > { %s1034_s6 = sshra.s32 %s201_s9, 4  ;;  %p1038_p10 = pneg %p1291_p2  ;;  %s1035_s6 = int_to_ptr.hbm [resolvable:$true] %s1034_s6 }
  0x26   : > { %s1036_s7 = scalar_lea.hbm %s1035_s6, 16  ;;  %s1041_s28 = scalar_lea.hbm %s1398_s0, 32 }
  0x27   : > { %p1037_p9 = scmp.ne.s32.totalorder %s1035_s6, %s1036_s7  ;;  %p1042_p0 = scmp.lt.s32.totalorder %s1035_s6, %s1398_s0 }
  0x28   : > { %p1043_p3 = scmp.lt.s32.totalorder %s1041_s28, %s1036_s7 }
  0x29   : > { %p1039_p12 = pnand %p1038_p10, %p1037_p9 }
  0x2a   : > { %p1044_p7 = por %p1043_p3, %p1042_p0 }
  0x2b   : > { %p1040_p13 = pneg %p1039_p12 }
  0x2d   : > { %p1045_p11 = pnand %p1044_p7, %p1040_p13 }
  0x2f   : > { %1048 = shalt.err (!%p1045_p11)
}
  0x30   : > { %s1415_s24 = smov 8   ;;  %s1416_s5 = smov 128  }
  0x31   : > { %911 = dma.hbm_to_vmem [thread:$0]  (!%p1291_p2), %s201_s9, 256, %s203_s8, %s191_s14, %s1416_s5, %s1416_s5, %s1415_s24  }
  0x32   : > { %s875_s2 = sshll.u32 %s1172_s18, 3  ;;  %s216_s20 = scalar_lea.vmem [#allocation5], %s874_s13 }
  0x33   : > { %s220_s27 = scalar_lea.hbm %s1399_s1, %s875_s2  ;;  %s224_s29 = sshll.u32 %s216_s20, 4  ;;  %s225_s29 = int_to_ptr.vmem [resolvable:$true] %s224_s29 }
  0x34   : > { %s222_s6 = sshll.u32 %s220_s27, 4  ;;  %s213_s7 = scalar_lea.sflag [#allocation6], %s212_s11  ;;  %s223_s6 = int_to_ptr.hbm [resolvable:$true] %s222_s6 }
  0x35   : > { %s1064_s28 = sshra.s32 %s223_s6, 4  ;;  %s1071_s14 = scalar_lea.hbm %s1399_s1, 16  ;;  %s1065_s28 = int_to_ptr.hbm [resolvable:$true] %s1064_s28 }
  0x36   : > { %s1066_s30 = scalar_lea.hbm %s1065_s28, 8  ;;  %p1072_p13 = scmp.lt.s32.totalorder %s1065_s28, %s1399_s1 }
  0x37   : > { %p1067_p11 = scmp.ne.s32.totalorder %s1065_s28, %s1066_s30  ;;  %p1073_p0 = scmp.lt.s32.totalorder %s1071_s14, %s1066_s30 }
  0x39   : > { %p1069_p9 = pnand %p1067_p11, %p1038_p10  ;;  %p1074_p3 = por %p1073_p0, %p1072_p13 }
  0x3b   : > { %p1070_p12 = pneg %p1069_p9 }
  0x3d   : > { %p1075_p7 = pnand %p1074_p3, %p1070_p12 }
  0x3f   : > { %1078 = shalt.err (!%p1075_p7)
}
  0x40   : > { %914 = dma.hbm_to_vmem [thread:$0]  (!%p1291_p2), %s223_s6, 128, %s225_s29, %s213_s7  }
  0x41   : > { %233 = sbr.rel (%p1249_p8) target bundleno = 933 (0x3a5), region = 36  ;;  %s1332_s20 = sand.u32 (!%p1249_p8), 1, %s1164_s16  }
  0x42   : > { %s877_s11 = sshll.u32 (!%p1249_p8), %s1332_s20, 4  ;;  %s236_s13 = scalar_lea.sflag (!%p1249_p8), [#allocation3], %s1332_s20 }
  0x43   : > { %s1336_s24 = scalar_lea.vmem (!%p1249_p8), [#allocation2], %s877_s11 }
  0x46   : > { %1139 = dma.done.wait (%p1236_p4), %s236_s13, 256  }
  0x47   : > { %1141 = vsyncadd (%p1236_p4), %s236_s13, 4294967040  ;;  %s245_s26 = sand.u32 1, %s1227_s19   ;;  %s878_s10 = sshll.u32 %s1332_s20, 3 }
  0x48   : > { %s246_s5 = scalar_lea.sflag [#allocation6], %s245_s26  ;;  %s1346_s25 = scalar_lea.vmem [#allocation5], %s878_s10 }
  0x49   : > { %1143 = dma.done.wait (%p1236_p4), %s246_s5, 128  }
  0x4a   : > { %1145 = vsyncadd (%p1236_p4), %s246_s5, 4294967168 }
  0x4b   : > { %1147 = dma.done.wait (%p45_p1), [#allocation6], 20480  }
  0x4c   : > { %1149 = vsyncadd (%p45_p1), [#allocation6], 4294946816 }
  0x4d   : > { %1151 = dma.done.wait (%p45_p1), [#allocation9], 144  }
  0x4e   : > { %1153 = vsyncadd (%p45_p1), [#allocation9], 4294967152  ;;  %v307_v0 = vld [vmem:[#allocation7 + $0x78] sm:$0xff]  ;;  %v306_v1 = vld [vmem:[#allocation7 + $0x70] sm:$0xff]  ;;  %s883_s21 = sshll.u32 %s1227_s19, 3  ;;  %s289_s7 = scalar_lea.vmem [#allocation10], %s878_s10 }
  0x4f   : > { %312 = vmatpush.msra.mxu0 %v307_v0  ;;  %v305_v2 = vld [vmem:[#allocation7 + $0x68] sm:$0xff]  ;;  %v304_v3 = vld [vmem:[#allocation7 + $0x60] sm:$0xff]  ;;  %v303_v4 = vld [vmem:[#allocation7 + $0x58] sm:$0xff]  ;;  %s749_s6 = scalar_lea.hbm %s1402_s4, %s883_s21  ;;  %s751_s28 = sshll.u32 %s289_s7, 4  ;;  %s752_s28 = int_to_ptr.vmem [resolvable:$true] %s751_s28 }
  0x50   : > { %v302_v5 = vld [vmem:[#allocation7 + $0x50] sm:$0xff]  ;;  %v301_v6 = vld [vmem:[#allocation7 + $0x48] sm:$0xff]  ;;  %v300_v7 = vld [vmem:[#allocation7 + $0x40] sm:$0xff]  ;;  %s753_s30 = sshll.u32 %s749_s6, 4  ;;  %s739_s8 = scalar_lea.sflag [#allocation4], %s1332_s20  ;;  %s754_s30 = int_to_ptr.hbm [resolvable:$true] %s753_s30 }
  0x51   : > { %313 = vmatpush.msra.mxu0 %v306_v1  ;;  %v299_v8 = vld [vmem:[#allocation7 + $0x38] sm:$0xff]  ;;  %v298_v9 = vld [vmem:[#allocation7 + $0x30] sm:$0xff]  ;;  %v297_v10 = vld [vmem:[#allocation7 + $0x28] sm:$0xff]  ;;  %s1108_s9 = sshra.s32 %s754_s30, 4  ;;  %s1114_s2 = scalar_lea.hbm %s1402_s4, 16  ;;  %s1109_s9 = int_to_ptr.hbm [resolvable:$true] %s1108_s9 }
  0x52   : > { %v296_v11 = vld [vmem:[#allocation7 + $0x20] sm:$0xff]  ;;  %v295_v12 = vld [vmem:[#allocation7 + $0x18] sm:$0xff]  ;;  %v294_v13 = vld [vmem:[#allocation7 + $0x10] sm:$0xff]  ;;  %s1110_s14 = scalar_lea.hbm %s1109_s9, 8  ;;  %p1115_p2 = scmp.lt.s32.totalorder %s1109_s9, %s1402_s4 }
  0x53   : > { %314 = vmatpush.msra.mxu0 %v305_v2  ;;  %v293_v14 = vld [vmem:[#allocation7 + $0x8] sm:$0xff]  ;;  %v292_v15 = vld [vmem:[#allocation7] sm:$0xff]  ;;  %v500_v17 = vld [vmem:[#allocation7 + $0x1f8] sm:$0xff]  ;;  %p1111_p1 = scmp.ne.s32.totalorder %s1109_s9, %s1110_s14  ;;  %p1116_p10 = scmp.lt.s32.totalorder %s1114_s2, %s1110_s14 }
  0x54   : > { %v290_v16 = vld [vmem:[%s1336_s24] sm:$0xff]  ;;  %v353_v19 = vld [vmem:[#allocation7 + $0xf8] sm:$0xff]  ;;  %v498_v21 = vld [vmem:[#allocation7 + $0x1e8] sm:$0xff] }
  0x55   : > { %315 = vmatpush.msra.mxu0 %v304_v3  ;;  %v499_v18 = vld [vmem:[#allocation7 + $0x1f0] sm:$0xff]  ;;  %359 = vmatpush.msra.mxu1 %v353_v19  ;;  %v351_v22 = vld [vmem:[#allocation7 + $0xe8] sm:$0xff]  ;;  %v497_v23 = vld [vmem:[#allocation7 + $0x1e0] sm:$0xff]  ;;  %p1112_p4 = pnand %p1111_p1, %p1278_p5  ;;  %p1117_p11 = por %p1116_p10, %p1115_p2 }
  0x56   : > { %v352_v20 = vld [vmem:[#allocation7 + $0xf0] sm:$0xff]  ;;  %v350_v24 = vld [vmem:[#allocation7 + $0xe0] sm:$0xff]  ;;  %v291_v25 = vld [vmem:[%s1336_s24 + $0x8] sm:$0xff] }
  0x57   : > { %316 = vmatpush.msra.mxu0 %v303_v4  ;;  %360 = vmatpush.msra.mxu1 %v352_v20  ;;  %v496_v26 = vld [vmem:[#allocation7 + $0x1d8] sm:$0xff]  ;;  %v495_v28 = vld [vmem:[#allocation7 + $0x1d0] sm:$0xff]  ;;  %v494_v30 = vld [vmem:[#allocation7 + $0x1c8] sm:$0xff]  ;;  %p1113_p8 = pneg %p1112_p4 }
  0x58   : > { %v349_v27 = vld [vmem:[#allocation7 + $0xd8] sm:$0xff]  ;;  %v348_v29 = vld [vmem:[#allocation7 + $0xd0] sm:$0xff]  ;;  %v347_v31 = vld [vmem:[#allocation7 + $0xc8] sm:$0xff] }
  0x59   : > { %317 = vmatpush.msra.mxu0 %v302_v5  ;;  %361 = vmatpush.msra.mxu1 %v351_v22  ;;  %v493_v32 = vld [vmem:[#allocation7 + $0x1c0] sm:$0xff]  ;;  %v492_v34 = vld [vmem:[#allocation7 + $0x1b8] sm:$0xff]  ;;  %v491_v36 = vld [vmem:[#allocation7 + $0x1b0] sm:$0xff]  ;;  %p1118_p9 = pnand %p1117_p11, %p1113_p8 }
  0x5a   : > { %v346_v33 = vld [vmem:[#allocation7 + $0xc0] sm:$0xff]  ;;  %v345_v35 = vld [vmem:[#allocation7 + $0xb8] sm:$0xff]  ;;  %v344_v37 = vld [vmem:[#allocation7 + $0xb0] sm:$0xff] }
  0x5b   : > { %318 = vmatpush.msra.mxu0 %v301_v6  ;;  %362 = vmatpush.msra.mxu1 %v350_v24  ;;  %v490_v38 = vld [vmem:[#allocation7 + $0x1a8] sm:$0xff]  ;;  %v489_v40 = vld [vmem:[#allocation7 + $0x1a0] sm:$0xff]  ;;  %v488_v42 = vld [vmem:[#allocation7 + $0x198] sm:$0xff] }
  0x5c   : > { %v343_v39 = vld [vmem:[#allocation7 + $0xa8] sm:$0xff]  ;;  %v342_v41 = vld [vmem:[#allocation7 + $0xa0] sm:$0xff]  ;;  %v341_v43 = vld [vmem:[#allocation7 + $0x98] sm:$0xff] }
  0x5d   : > { %319 = vmatpush.msra.mxu0 %v300_v7  ;;  %363 = vmatpush.msra.mxu1 %v349_v27  ;;  %v487_v44 = vld [vmem:[#allocation7 + $0x190] sm:$0xff]  ;;  %v486_v45 = vld [vmem:[#allocation7 + $0x188] sm:$0xff]  ;;  %v485_v46 = vld [vmem:[#allocation7 + $0x180] sm:$0xff] }
  0x5e   : > { %v483_v47 = vld [vmem:[%s1346_s25] sm:$0xff]  ;;  %v339_v49 = vld [vmem:[#allocation7 + $0x88] sm:$0xff]  ;;  %v338_v50 = vld [vmem:[#allocation7 + $0x80] sm:$0xff] }
  0x5f   : > { %320 = vmatpush.msra.mxu0 %v299_v8  ;;  %364 = vmatpush.msra.mxu1 %v348_v29  ;;  %v340_v48 = vld [vmem:[#allocation7 + $0x90] sm:$0xff]  ;;  %v543_v51 = vld [vmem:[#allocation7 + $0x278] sm:$0xff]  ;;  %v541_v53 = vld [vmem:[#allocation7 + $0x268] sm:$0xff] }
  0x60   : > { %v542_v52 = vld [vmem:[#allocation7 + $0x270] sm:$0xff]  ;;  %v540_v54 = vld [vmem:[#allocation7 + $0x260] sm:$0xff]  ;;  %v539_v55 = vld [vmem:[#allocation7 + $0x258] sm:$0xff] }
  0x61   : > { %321 = vmatpush.msra.mxu0 %v298_v9  ;;  %365 = vmatpush.msra.mxu1 %v347_v31  ;;  %v538_v56 = vld [vmem:[#allocation7 + $0x250] sm:$0xff]  ;;  %v537_v57 = vld [vmem:[#allocation7 + $0x248] sm:$0xff]  ;;  %v536_v58 = vld [vmem:[#allocation7 + $0x240] sm:$0xff] }
  0x62   : > { %v535_v59 = vld [vmem:[#allocation7 + $0x238] sm:$0xff]  ;;  %v534_v60 = vld [vmem:[#allocation7 + $0x230] sm:$0xff]  ;;  %v533_v61 = vld [vmem:[#allocation7 + $0x228] sm:$0xff] }
  0x63   : > { %322 = vmatpush.msra.mxu0 %v297_v10  ;;  %366 = vmatpush.msra.mxu1 %v346_v33  ;;  %v532_v62 = vld [vmem:[#allocation7 + $0x220] sm:$0xff]  ;;  %v531_v63 = vld [vmem:[#allocation7 + $0x218] sm:$0xff]  ;;  %v530_v1 = vld [vmem:[#allocation7 + $0x210] sm:$0xff] }
  0x64   : > { %v964_v0 = vld [vmem:[#allocation8] ss:$0 sm:$0xff]  ;;  %v529_v4 = vld [vmem:[#allocation7 + $0x208] sm:$0xff]  ;;  %v400_v7 = vld [vmem:[#allocation7 + $0x178] sm:$0xff] }
  0x65   : > { %323 = vmatpush.msra.mxu0 %v296_v11  ;;  %367 = vmatpush.msra.mxu1 %v345_v35  ;;  %v528_v6 = vld [vmem:[#allocation7 + $0x200] sm:$0xff]  ;;  %v399_v8 = vld [vmem:[#allocation7 + $0x170] sm:$0xff]  ;;  %v398_v9 = vld [vmem:[#allocation7 + $0x168] sm:$0xff] }
  0x66   : > { %406 = vmatpush.msra.mxu2 %v400_v7  ;;  %v391_v19 = vld [vmem:[#allocation7 + $0x130] sm:$0xff]  ;;  %v390_v20 = vld [vmem:[#allocation7 + $0x128] sm:$0xff]  ;;  %v388_v22 = vld [vmem:[#allocation7 + $0x118] sm:$0xff] }
  0x67   : > { %324 = vmatpush.msra.mxu0 %v295_v12  ;;  %368 = vmatpush.msra.mxu1 %v344_v37  ;;  %v397_v12 = vld [vmem:[#allocation7 + $0x160] sm:$0xff]  ;;  %v387_v27 = vld [vmem:[#allocation7 + $0x110] sm:$0xff]  ;;  %v446_v7 = vld [vmem:[#allocation7 + $0x308] sm:$0xff] }
  0x68   : > { %407 = vmatpush.msra.mxu2 %v399_v8  ;;  %v385_v29 = vld [vmem:[#allocation7 + $0x100] sm:$0xff]  ;;  %v585_v31 = vld [vmem:[#allocation7 + $0x2f0] sm:$0xff] }
  0x69   : > { %325 = vmatpush.msra.mxu0 %v294_v13  ;;  %369 = vmatpush.msra.mxu1 %v343_v39  ;;  %v583_v33 = vld [vmem:[#allocation7 + $0x2e0] sm:$0xff]  ;;  %v581_v35 = vld [vmem:[#allocation7 + $0x2d0] sm:$0xff] }
  0x6a   : > { %408 = vmatpush.msra.mxu2 %v398_v9  ;;  %v579_v37 = vld [vmem:[#allocation7 + $0x2c0] sm:$0xff]  ;;  %v577_v39 = vld [vmem:[#allocation7 + $0x2b0] sm:$0xff]  ;;  %v628_v9 = vld [vmem:[#allocation7 + $0x3f8] sm:$0xff] }
  0x6b   : > { %326 = vmatpush.msra.mxu0 %v293_v14  ;;  %370 = vmatpush.msra.mxu1 %v342_v41  ;;  %v396_v14 = vld [vmem:[#allocation7 + $0x158] sm:$0xff]  ;;  %v575_v41 = vld [vmem:[#allocation7 + $0x2a0] sm:$0xff] }
  0x6c   : > { %409 = vmatpush.msra.mxu2 %v397_v12  ;;  %v445_v8 = vld [vmem:[#allocation7 + $0x300] sm:$0xff] }
  0x6d   : > { %327 = vmatpush.msra.mxu0 %v292_v15  ;;  %371 = vmatpush.msra.mxu1 %v341_v43  ;;  %v395_v15 = vld [vmem:[#allocation7 + $0x150] sm:$0xff]  ;;  %v966_v43 = vld [vmem:[#allocation8 + $0x1] ss:$0 sm:$0xff] }
  0x6e   : > { %328 = vmatmul.f32.vlgmr.msra.gmra.mxu0 %v290_v16  ;;  %410 = vmatpush.msra.mxu2 %v396_v14  ;;  %v394_v16 = vld [vmem:[#allocation7 + $0x148] sm:$0xff]  ;;  %v625_v12 = vld [vmem:[#allocation7 + $0x3e0] sm:$0xff]  ;;  %v623_v14 = vld [vmem:[#allocation7 + $0x3d0] sm:$0xff] }
  0x6f   : > { %506 = vmatpush.msrb.mxu0 %v500_v17  ;;  %372 = vmatpush.msra.mxu1 %v340_v48  ;;  %v393_v17 = vld [vmem:[#allocation7 + $0x140] sm:$0xff] }
  0x70   : > { %411 = vmatpush.msra.mxu2 %v395_v15  ;;  %v622_v15 = vld [vmem:[#allocation7 + $0x3c8] sm:$0xff] }
  0x71   : > { %507 = vmatpush.msrb.mxu0 %v499_v18  ;;  %373 = vmatpush.msra.mxu1 %v339_v49  ;;  %v392_v18 = vld [vmem:[#allocation7 + $0x138] sm:$0xff]  ;;  %v571_v49 = vld [vmem:[#allocation7 + $0x280] sm:$0xff] }
  0x72   : > { %412 = vmatpush.msra.mxu2 %v394_v16  ;;  %v621_v16 = vld [vmem:[#allocation7 + $0x3c0] sm:$0xff] }
  0x73   : > { %508 = vmatpush.msrb.mxu0 %v498_v21  ;;  %374 = vmatpush.msra.mxu1 %v338_v50  ;;  %v389_v21 = vld [vmem:[#allocation7 + $0x120] sm:$0xff]  ;;  %v460_v50 = vld [vmem:[#allocation7 + $0x378] sm:$0xff] }
  0x74   : > { %413 = vmatpush.msra.mxu2 %v393_v17  ;;  %463 = vmatpush.msra.mxu3 %v460_v50  ;;  %v620_v17 = vld [vmem:[#allocation7 + $0x3b8] sm:$0xff] }
  0x75   : > { %509 = vmatpush.msrb.mxu0 %v497_v23  ;;  %549 = vmatpush.msrb.mxu1 %v543_v51  ;;  %v965_v23 = vld [vmem:[#allocation8 + $0x3] ss:$0 sm:$0xff]  ;;  %v459_v51 = vld [vmem:[#allocation7 + $0x370] sm:$0xff] }
  0x76   : > { %331 = vmatmul.f32.gmra.mxu0 %v291_v25  ;;  %414 = vmatpush.msra.mxu2 %v392_v18  ;;  %v619_v18 = vld [vmem:[#allocation7 + $0x3b0] sm:$0xff] }
  0x77   : > { %510 = vmatpush.msrb.mxu0 %v496_v26  ;;  %550 = vmatpush.msrb.mxu1 %v542_v52  ;;  %v458_v52 = vld [vmem:[#allocation7 + $0x368] sm:$0xff] }
  0x78   : > { %415 = vmatpush.msra.mxu2 %v391_v19  ;;  %464 = vmatpush.msra.mxu3 %v459_v51  ;;  %v618_v19 = vld [vmem:[#allocation7 + $0x3a8] sm:$0xff] }
  0x79   : > { %511 = vmatpush.msrb.mxu0 %v495_v28  ;;  %551 = vmatpush.msrb.mxu1 %v541_v53  ;;  %v386_v28 = vld [vmem:[#allocation7 + $0x108] sm:$0xff] }
  0x7a   : > { %416 = vmatpush.msra.mxu2 %v390_v20  ;;  %465 = vmatpush.msra.mxu3 %v458_v52  ;;  %v617_v20 = vld [vmem:[#allocation7 + $0x3a0] sm:$0xff] }
  0x7b   : > { %512 = vmatpush.msrb.mxu0 %v494_v30  ;;  %552 = vmatpush.msrb.mxu1 %v540_v54  ;;  %v586_v30 = vld [vmem:[#allocation7 + $0x2f8] sm:$0xff] }
  0x7c   : > { %417 = vmatpush.msra.mxu2 %v389_v21  ;;  %v616_v21 = vld [vmem:[#allocation7 + $0x398] sm:$0xff] }
  0x7d   : > { %513 = vmatpush.msrb.mxu0 %v493_v32  ;;  %553 = vmatpush.msrb.mxu1 %v539_v55  ;;  %v584_v32 = vld [vmem:[#allocation7 + $0x2e8] sm:$0xff]  ;;  %v457_v55 = vld [vmem:[#allocation7 + $0x360] sm:$0xff] }
  0x7e   : > { %418 = vmatpush.msra.mxu2 %v388_v22  ;;  %466 = vmatpush.msra.mxu3 %v457_v55  ;;  %v615_v22 = vld [vmem:[#allocation7 + $0x390] sm:$0xff] }
  0x7f   : > { %514 = vmatpush.msrb.mxu0 %v492_v34  ;;  %554 = vmatpush.msrb.mxu1 %v538_v56  ;;  %v582_v34 = vld [vmem:[#allocation7 + $0x2d8] sm:$0xff] }
  0x80   : > { %419 = vmatpush.msra.mxu2 %v387_v27 }
  0x81   : > { %515 = vmatpush.msrb.mxu0 %v491_v36  ;;  %555 = vmatpush.msrb.mxu1 %v537_v57  ;;  %v580_v36 = vld [vmem:[#allocation7 + $0x2c8] sm:$0xff]  ;;  %v456_v57 = vld [vmem:[#allocation7 + $0x358] sm:$0xff] }
  0x82   : > { %420 = vmatpush.msra.mxu2 %v386_v28  ;;  %467 = vmatpush.msra.mxu3 %v456_v57  ;;  %v668_v28 = vld [vmem:[#allocation7 + $0x478] sm:$0xff]  ;;  %v659_v57 = vld [vmem:[#allocation7 + $0x430] sm:$0xff] }
  0x83   : > { %516 = vmatpush.msrb.mxu0 %v490_v38  ;;  %556 = vmatpush.msrb.mxu1 %v536_v58  ;;  %v578_v38 = vld [vmem:[#allocation7 + $0x2b8] sm:$0xff]  ;;  %v455_v58 = vld [vmem:[#allocation7 + $0x350] sm:$0xff] }
  0x84   : > { %421 = vmatpush.msra.mxu2 %v385_v29  ;;  %468 = vmatpush.msra.mxu3 %v455_v58  ;;  %v667_v29 = vld [vmem:[#allocation7 + $0x470] sm:$0xff]  ;;  %v658_v58 = vld [vmem:[#allocation7 + $0x428] sm:$0xff] }
  0x85   : > { %517 = vmatpush.msrb.mxu0 %v489_v40  ;;  %557 = vmatpush.msrb.mxu1 %v535_v59  ;;  %v576_v40 = vld [vmem:[#allocation7 + $0x2a8] sm:$0xff] }
  0x86   : > { %592 = vmatpush.msrb.mxu2 %v586_v30  ;;  %v454_v59 = vld [vmem:[#allocation7 + $0x348] sm:$0xff]  ;;  %v968_v30 = vld [vmem:[#allocation8 + $0x2] ss:$0 sm:$0xff] }
  0x87   : > { %518 = vmatpush.msrb.mxu0 %v488_v42  ;;  %558 = vmatpush.msrb.mxu1 %v534_v60  ;;  %v574_v42 = vld [vmem:[#allocation7 + $0x298] sm:$0xff]  ;;  %v453_v60 = vld [vmem:[#allocation7 + $0x340] sm:$0xff] }
  0x88   : > { %593 = vmatpush.msrb.mxu2 %v585_v31  ;;  %469 = vmatpush.msra.mxu3 %v454_v59  ;;  %v666_v31 = vld [vmem:[#allocation7 + $0x468] sm:$0xff]  ;;  %v657_v59 = vld [vmem:[#allocation7 + $0x420] sm:$0xff] }
  0x89   : > { %519 = vmatpush.msrb.mxu0 %v487_v44  ;;  %559 = vmatpush.msrb.mxu1 %v533_v61  ;;  %v573_v44 = vld [vmem:[#allocation7 + $0x290] sm:$0xff]  ;;  %v452_v61 = vld [vmem:[#allocation7 + $0x338] sm:$0xff] }
  0x8a   : > { %594 = vmatpush.msrb.mxu2 %v584_v32  ;;  %470 = vmatpush.msra.mxu3 %v453_v60  ;;  %v656_v60 = vld [vmem:[#allocation7 + $0x418] sm:$0xff] }
  0x8b   : > { %520 = vmatpush.msrb.mxu0 %v486_v45  ;;  %560 = vmatpush.msrb.mxu1 %v532_v62  ;;  %v451_v62 = vld [vmem:[#allocation7 + $0x330] sm:$0xff] }
  0x8c   : > { %595 = vmatpush.msrb.mxu2 %v583_v33  ;;  %471 = vmatpush.msra.mxu3 %v452_v61  ;;  %v665_v33 = vld [vmem:[#allocation7 + $0x460] sm:$0xff]  ;;  %v655_v61 = vld [vmem:[#allocation7 + $0x410] sm:$0xff] }
  0x8d   : > { %521 = vmatpush.msrb.mxu0 %v485_v46  ;;  %561 = vmatpush.msrb.mxu1 %v531_v63  ;;  %v450_v63 = vld [vmem:[#allocation7 + $0x328] sm:$0xff] }
  0x8e   : > { %522 = vmatmul.f32.vlgmr.msrb.gmra.mxu0 %v483_v47  ;;  %596 = vmatpush.msrb.mxu2 %v582_v34  ;;  %v572_v47 = vld [vmem:[#allocation7 + $0x288] sm:$0xff] }
  0x8f   : > { %562 = vmatpush.msrb.mxu1 %v530_v1  ;;  %472 = vmatpush.msra.mxu3 %v451_v62  ;;  %v448_v1 = vld [vmem:[#allocation7 + $0x318] sm:$0xff]  ;;  %v654_v62 = vld [vmem:[#allocation7 + $0x408] sm:$0xff] }
  0x90   : > { %597 = vmatpush.msrb.mxu2 %v581_v35  ;;  %674 = vmatpush.msra.mxu0 %v668_v28 }
  0x91   : > { %563 = vmatpush.msrb.mxu1 %v529_v4  ;;  %473 = vmatpush.msra.mxu3 %v450_v63  ;;  %v653_v63 = vld [vmem:[#allocation7 + $0x400] sm:$0xff] }
  0x92   : > { %598 = vmatpush.msrb.mxu2 %v580_v36  ;;  %675 = vmatpush.msra.mxu0 %v667_v29 }
  0x93   : > { %564 = vmatpush.msrb.mxu1 %v528_v6 }
  0x94   : > { %599 = vmatpush.msrb.mxu2 %v579_v37  ;;  %676 = vmatpush.msra.mxu0 %v666_v31  ;;  %v664_v37 = vld [vmem:[#allocation7 + $0x458] sm:$0xff] }
  0x96   : > { %600 = vmatpush.msrb.mxu2 %v578_v38  ;;  %677 = vmatpush.msra.mxu0 %v665_v33 }
  0x98   : > { %601 = vmatpush.msrb.mxu2 %v577_v39  ;;  %678 = vmatpush.msra.mxu0 %v664_v37 }
  0x9a   : > { %602 = vmatpush.msrb.mxu2 %v576_v40  ;;  %v663_v40 = vld [vmem:[#allocation7 + $0x450] sm:$0xff] }
  0x9b   : > { %679 = vmatpush.msra.mxu0 %v663_v40 }
  0x9c   : > { %603 = vmatpush.msrb.mxu2 %v575_v41 }
  0x9e   : > { %604 = vmatpush.msrb.mxu2 %v574_v42  ;;  %v662_v42 = vld [vmem:[#allocation7 + $0x448] sm:$0xff] }
  0x9f   : > { %680 = vmatpush.msra.mxu0 %v662_v42 }
  0xa0   : > { %605 = vmatpush.msrb.mxu2 %v573_v44 }
  0xa2   : > { %606 = vmatpush.msrb.mxu2 %v572_v47  ;;  %v660_v47 = vld [vmem:[#allocation7 + $0x438] sm:$0xff] }
  0xa4   : > { %607 = vmatpush.msrb.mxu2 %v571_v49 }
  0xeb   : > { %v329_v2 = vpop.f32.mrf.mxu0 }
  0xec   : > { %v330_v3 = vadd.f32 %v964_v0, %v329_v2  ;;  %v967_v2 = vld [vmem:[#allocation8 + $0x4] ss:$0 sm:$0xff] }
  0xee   : > { %v335_v5 = vmax.f32 %v330_v3, 0.0  ;;  %v447_v3 = vld [vmem:[#allocation7 + $0x310] sm:$0xff] }
  0xf0   : > { %375 = vmatmul.f32.vlgmr.msra.gmra.mxu1 %v335_v5 }
  0xf3   : > { %v332_v10 = vpop.f32.mrf.mxu0 }
  0xf4   : > { %v333_v11 = vadd.f32 %v964_v0, %v332_v10  ;;  %v449_v0 = vld [vmem:[#allocation7 + $0x320] sm:$0xff]  ;;  %v627_v10 = vld [vmem:[#allocation7 + $0x3f0] sm:$0xff] }
  0xf5   : > { %474 = vmatpush.msra.mxu3 %v449_v0  ;;  %v711_v0 = vld [vmem:[#allocation7 + $0x4f8] sm:$0xff] }
  0xf6   : > { %v336_v13 = vmax.f32 %v333_v11, 0.0  ;;  %v626_v11 = vld [vmem:[#allocation7 + $0x3e8] sm:$0xff]  ;;  %717 = vmatpush.msra.mxu1 %v711_v0 }
  0xf7   : > { %475 = vmatpush.msra.mxu3 %v448_v1  ;;  %v710_v1 = vld [vmem:[#allocation7 + $0x4f0] sm:$0xff] }
  0xf8   : > { %378 = vmatmul.f32.gmra.mxu1 %v336_v13  ;;  %v624_v13 = vld [vmem:[#allocation7 + $0x3d8] sm:$0xff] }
  0xf9   : > { %476 = vmatpush.msra.mxu3 %v447_v3  ;;  %718 = vmatpush.msra.mxu1 %v710_v1  ;;  %v708_v3 = vld [vmem:[#allocation7 + $0x4e0] sm:$0xff] }
  0xfb   : > { %477 = vmatpush.msra.mxu3 %v446_v7  ;;  %v704_v7 = vld [vmem:[#allocation7 + $0x4c0] sm:$0xff] }
  0xfd   : > { %478 = vmatpush.msra.mxu3 %v445_v8  ;;  %v703_v8 = vld [vmem:[#allocation7 + $0x4b8] sm:$0xff] }
  0xff   : > { %629 = vmatpush.msrb.mxu3 %v628_v9  ;;  %v702_v9 = vld [vmem:[#allocation7 + $0x4b0] sm:$0xff] }
 0x101   : > { %630 = vmatpush.msrb.mxu3 %v627_v10  ;;  %v701_v10 = vld [vmem:[#allocation7 + $0x4a8] sm:$0xff] }
 0x103   : > { %631 = vmatpush.msrb.mxu3 %v626_v11  ;;  %v462_v11 = vld [vmem:[#allocation8 + $0x6] sm:$0x1] }
 0x105   : > { %632 = vmatpush.msrb.mxu3 %v625_v12 }
 0x107   : > { %633 = vmatpush.msrb.mxu3 %v624_v13  ;;  %v700_v13 = vld [vmem:[#allocation7 + $0x4a0] sm:$0xff] }
 0x109   : > { %634 = vmatpush.msrb.mxu3 %v623_v14 }
 0x10b   : > { %v523_v24 = vpop.f32.mrf.mxu0  ;;  %635 = vmatpush.msrb.mxu3 %v622_v15  ;;  %v699_v15 = vld [vmem:[#allocation7 + $0x498] sm:$0xff] }
 0x10c   : > { %v524_v25 = vadd.f32 %v965_v23, %v523_v24  ;;  %v1180_v23 = vmov 16.0   ;;  %v614_v24 = vld [vmem:[#allocation7 + $0x388] sm:$0xff] }
 0x10d   : > { %636 = vmatpush.msrb.mxu3 %v621_v16  ;;  %972 = vrcp.f32 %v1180_v23  ;;  %v970_v23 = vld [vmem:[#allocation8 + $0x7] ss:$0 sm:$0xff] }
 0x10e   : > { %v526_v26 = vmax.f32 %v524_v25, 0.0 }
 0x10f   : > { %637 = vmatpush.msrb.mxu3 %v620_v17 }
 0x110   : > { %565 = vmatmul.f32.vlgmr.msrb.gmra.mxu1 %v526_v26  ;;  %v613_v26 = vld [vmem:[#allocation7 + $0x380] sm:$0xff] }
 0x111   : > { %638 = vmatpush.msrb.mxu3 %v619_v18 }
 0x113   : > { %639 = vmatpush.msrb.mxu3 %v618_v19  ;;  %v973_v27 = vpop.eup %972 }
 0x114   : > { %v437_v32 = vmul.f32 16.0, %v973_v27  ;;  %vm441_vm0 = vweird.f32 %v973_v27 }
 0x115   : > { %640 = vmatpush.msrb.mxu3 %v617_v20  ;;  %v698_v20 = vld [vmem:[#allocation7 + $0x490] sm:$0xff] }
 0x116   : > { %v438_v38 = vsub.f32 1.0, %v437_v32 }
 0x117   : > { %641 = vmatpush.msrb.mxu3 %v616_v21  ;;  %v697_v21 = vld [vmem:[#allocation7 + $0x488] sm:$0xff] }
 0x119   : > { %642 = vmatpush.msrb.mxu3 %v615_v22  ;;  %v696_v22 = vld [vmem:[#allocation7 + $0x480] sm:$0xff] }
 0x11b   : > { %643 = vmatpush.msrb.mxu3 %v614_v24 }
 0x11d   : > { %644 = vmatpush.msrb.mxu3 %v613_v26 }
 0x16d   : > { %v376_v45 = vpop.f32.mrf.mxu1 }
 0x16e   : > { %v377_v46 = vadd.f32 %v966_v43, %v376_v45  ;;  %v661_v45 = vld [vmem:[#allocation7 + $0x440] sm:$0xff] }
 0x16f   : > { %681 = vmatpush.msra.mxu0 %v661_v45 }
 0x170   : > { %v382_v48 = vmax.f32 %v377_v46, 0.0 }
 0x171   : > { %682 = vmatpush.msra.mxu0 %v660_v47 }
 0x172   : > { %422 = vmatmul.f32.vlgmr.msra.gmra.mxu2 %v382_v48 }
 0x173   : > { %683 = vmatpush.msra.mxu0 %v659_v57 }
 0x175   : > { %v379_v53 = vpop.f32.mrf.mxu1  ;;  %684 = vmatpush.msra.mxu0 %v658_v58 }
 0x176   : > { %v380_v54 = vadd.f32 %v966_v43, %v379_v53  ;;  %v439_v43 = vmul.f32 %v973_v27, %v438_v38 }
 0x177   : > { %685 = vmatpush.msra.mxu0 %v657_v59 }
 0x178   : > { %v383_v56 = vmax.f32 %v380_v54, 0.0  ;;  %v440_v48 = vadd.f32 %v973_v27, %v439_v43  ;;  %v969_v54 = vld [vmem:[#allocation8 + $0x5] ss:$0 sm:$0xff] }
 0x179   : > { %686 = vmatpush.msra.mxu0 %v656_v60 }
 0x17a   : > { %425 = vmatmul.f32.gmra.mxu2 %v383_v56  ;;  %v442_v51 = vsel %vm441_vm0, %v973_v27, %v440_v48  ;;  %v971_v27 = vld [vmem:[#allocation8 + $0x8] ss:$0 sm:$0xff] }
 0x17b   : > { %687 = vmatpush.msra.mxu0 %v655_v61 }
 0x17d   : > { %688 = vmatpush.msra.mxu0 %v654_v62 }
 0x17f   : > { %689 = vmatpush.msra.mxu0 %v653_v63 }
 0x18d   : > { %v566_v4 = vpop.f32.mrf.mxu1 }
 0x18e   : > { %v567_v5 = vadd.f32 %v967_v2, %v566_v4  ;;  %v709_v2 = vld [vmem:[#allocation7 + $0x4e8] sm:$0xff]  ;;  %v707_v4 = vld [vmem:[#allocation7 + $0x4d8] sm:$0xff] }
 0x18f   : > { %719 = vmatpush.msra.mxu1 %v709_v2 }
 0x190   : > { %v569_v6 = vmax.f32 %v567_v5, 0.0  ;;  %v706_v5 = vld [vmem:[#allocation7 + $0x4d0] sm:$0xff] }
 0x191   : > { %720 = vmatpush.msra.mxu1 %v708_v3 }
 0x192   : > { %608 = vmatmul.f32.vlgmr.msrb.gmra.mxu2 %v569_v6  ;;  %v705_v6 = vld [vmem:[#allocation7 + $0x4c8] sm:$0xff] }
 0x193   : > { %721 = vmatpush.msra.mxu1 %v707_v4 }
 0x195   : > { %722 = vmatpush.msra.mxu1 %v706_v5 }
 0x197   : > { %723 = vmatpush.msra.mxu1 %v705_v6 }
 0x199   : > { %724 = vmatpush.msra.mxu1 %v704_v7 }
 0x19b   : > { %725 = vmatpush.msra.mxu1 %v703_v8 }
 0x19d   : > { %726 = vmatpush.msra.mxu1 %v702_v9 }
 0x19f   : > { %727 = vmatpush.msra.mxu1 %v701_v10 }
 0x1a1   : > { %728 = vmatpush.msra.mxu1 %v700_v13 }
 0x1a3   : > { %729 = vmatpush.msra.mxu1 %v699_v15 }
 0x1a5   : > { %730 = vmatpush.msra.mxu1 %v698_v20 }
 0x1a7   : > { %731 = vmatpush.msra.mxu1 %v697_v21 }
 0x1a9   : > { %732 = vmatpush.msra.mxu1 %v696_v22 }
 0x1f5   : > { %v423_v25 = vpop.f32.mrf.mxu2 }
 0x1f6   : > { %v424_v35 = vadd.f32 %v968_v30, %v423_v25 }
 0x1fd   : > { %v426_v34 = vpop.f32.mrf.mxu2 }
 0x1fe   : > { %v427_v36 = vadd.f32 %v968_v30, %v426_v34 }
 0x200   : > { %v429_v39 = vadd.f32 %v427_v36, %v424_v35 }
 0x202   : > { %v430_v41 = vrot.slane %v429_v39, 4 }
 0x204   : > { %v431_v44 = vadd.f32 %v430_v41, %v429_v39 }
 0x206   : > { %v432_v46 = vrot.slane %v431_v44, 2 }
 0x208   : > { %v433_v49 = vadd.f32 %v432_v46, %v431_v44 }
 0x20a   : > { %v434_v50 = vrot.slane %v433_v49, 1 }
 0x20c   : > { %v435_v52 = vadd.f32 %v434_v50, %v433_v49 }
 0x20e   : > { %v443_v53 = vmul.f32 %v442_v51, %v435_v52 }
 0x210   : > { %479 = vmatmul.f32.vlgmr.msra.gmra.mxu3 %v443_v53 }
 0x215   : > { %v609_v55 = vpop.f32.mrf.mxu2 }
 0x216   : > { %v610_v56 = vadd.f32 %v969_v54, %v609_v55 }
 0x218   : > { %645 = vmatmul.f32.vlgmr.msrb.gmra.mxu3 %v610_v56 }
 0x293   : > { %v480_v12 = vpop.f32.mrf.mxu3 }
 0x294   : > { %v481_v14 = vadd.f32 %v480_v12, %v462_v11 }
 0x296   : > { %v649_v16 = vperm.slane %v481_v14, 0 }
 0x29b   : > { %v646_v17 = vpop.f32.mrf.mxu3 }
 0x29c   : > { %v650_v18 = vadd.f32 %v649_v16, %v646_v17 }
 0x29e   : > { %v651_v19 = vmax.f32 %v650_v18, 0.0 }
 0x2a0   : > { %690 = vmatmul.f32.vlgmr.msra.gmra.mxu0 %v651_v19 }
 0x31d   : > { %v691_v24 = vpop.f32.mrf.mxu0 }
 0x31e   : > { %v692_v25 = vadd.f32 %v970_v23, %v691_v24 }
 0x320   : > { %v694_v26 = vmax.f32 %v692_v25, 0.0 }
 0x322   : > { %733 = vmatmul.f32.vlgmr.msra.gmra.mxu1 %v694_v26 }
 0x39f   : > { %v734_v28 = vpop.f32.mrf.mxu1 }
 0x3a0   : > { %v735_v29 = vadd.f32 %v971_v27, %v734_v28 }
 0x3a2   : > { %737 = vst [vmem:[%s289_s7] sm:$0xff] %v735_v29 }
 0x3a3   : > { %1121 = shalt.err (!%p1118_p9)
}
 0x3a4   : > { %899 = dma.vmem_to_hbm [thread:$0]  (%p1278_p5), %s752_s28, 128, %s754_s30, %s739_s8  }
 0x3a5 PF: > { %s765_s20 = sand.u32 1, %s1160_s15   ;;  %p1417_p12 = scmp.ge.s32.totalorder %s1172_s18, 2 }
 0x3a6   : > { %s766_s24 = scalar_lea.sflag [#allocation4], %s765_s20 }
 0x3a7   : > { %p916_p13 = pnand %p1417_p12, %p1241_p6 }
 0x3a9   : > { %p917_p0 = pneg %p916_p13 }
 0x3ab   : > { %1155 = dma.done.wait (%p917_p0), %s766_s24, 128  }
 0x3ac   : > { %1157 = vsyncadd (%p917_p0), %s766_s24, 4294967168  ;;  %s1418_s26 = sld [smem:[#allocation16_spill]]  ;;  %p21_p3 = scmp.ge.s32.totalorder %s1265_s12, 4  }
 0x3ad   : > { %s1419_s15 = smov %s1164_s16  ;;  %s1420_s16 = smov %s1168_s17 }
 0x3ae   : > { %s1422_s18 = smov %s1265_s12  ;;  %23 = sbr.rel (!%p21_p3) target bundleno = 11 (0xb), region = 119 }
 0x3b2   : > { %s1421_s17 = smov %s1418_s26 }
 0x3b3   :  { %772 = vsyncpa [#allocation3], 1 }
 0x3b4   :  { %774 = vsyncpa [#allocation3 + $0x1], 1 }
 0x3b5   :  { %775 = vsyncpa [#allocation6], 1 }
 0x3b6   :  { %777 = vsyncpa [#allocation6 + $0x1], 1 }
 0x3b7   :  { %778 = vsyncpa [#allocation9], 1 }
 0x3b8   :  { %779 = vsyncpa [#allocation4], 1 }
 0x3b9   :  { %781 = vsyncpa [#allocation4 + $0x1], 1 }

</bundles_post_ra>
